<compile_context>
chip_gen: v7x
topology: tpu7x:2x2x1
jax: 0.10.0
libtpu: 0.0.40
codegen_flags: <defaults>
</compile_context>

<pallas_src>
import functools

import jax
import jax.numpy as jnp
from jax.experimental import pallas as pl
from jax.experimental.pallas import tpu as pltpu

NEG_SLOPE = 0.2   # GATConv default negative_slope
MASK_BIG = 1e9    # additive mask for non-edges


def _round_up(a, b):
    return ((a + b - 1) // b) * b


# ---------------------------------------------------------------------------
# Kernel 1: hoisted projection  xw = x@W,  a_src = xw@Asrc,  a_dst = xw@Adst
# ---------------------------------------------------------------------------
def _proj_kernel(x_ref, w_ref, awsrc_ref, awdst_ref, xw_ref, asrc_ref, adst_ref):
    xw = jnp.dot(x_ref[...], w_ref[...], preferred_element_type=jnp.float32)
    xw_bf = xw.astype(jnp.bfloat16)
    xw_ref[...] = xw_bf
    asrc_ref[...] = jnp.dot(xw_bf, awsrc_ref[...], preferred_element_type=jnp.float32)
    adst_ref[...] = jnp.dot(xw_bf, awdst_ref[...], preferred_element_type=jnp.float32)


def _project(x_bf, w_bf, aw_src, aw_dst, *, tile_p):
    n_pad, f_in = x_bf.shape
    hc = w_bf.shape[1]
    heads = aw_src.shape[1]
    return pl.pallas_call(
        _proj_kernel,
        out_shape=(jax.ShapeDtypeStruct((n_pad, hc), jnp.bfloat16),
                   jax.ShapeDtypeStruct((n_pad, heads), jnp.float32),
                   jax.ShapeDtypeStruct((n_pad, heads), jnp.float32)),
        grid_spec=pltpu.PrefetchScalarGridSpec(
            num_scalar_prefetch=0,
            grid=(n_pad // tile_p,),
            in_specs=[
                pl.BlockSpec((tile_p, f_in), lambda i: (i, 0)),   # x tile
                pl.BlockSpec((f_in, hc), lambda i: (0, 0)),       # W (lane-dense)
                pl.BlockSpec((hc, heads), lambda i: (0, 0)),      # Asrc
                pl.BlockSpec((hc, heads), lambda i: (0, 0)),      # Adst
            ],
            out_specs=[
                pl.BlockSpec((tile_p, hc), lambda i: (i, 0)),
                pl.BlockSpec((tile_p, heads), lambda i: (i, 0)),
                pl.BlockSpec((tile_p, heads), lambda i: (i, 0)),
            ]),
        compiler_params=pltpu.CompilerParams(
            dimension_semantics=("parallel",),
            vmem_limit_bytes=48 * 1024 * 1024),
    )(x_bf, w_bf, aw_src, aw_dst)


# ---------------------------------------------------------------------------
# Kernel 2: attention + aggregation with online softmax over src tiles
# ---------------------------------------------------------------------------
def _gat_attn_kernel(counts_ref, adst_ref, asrct_ref, xw_ref, adj_ref, bias_ref,
                     out_ref, m_sc, l_sc, acc_sc,
                     *, heads, out_ch, concat, apply_elu):
    i = pl.program_id(0)
    j = pl.program_id(1)
    nj = pl.num_programs(1)

    @pl.when(j == 0)
    def _():
        m_sc[...] = jnp.full_like(m_sc, -jnp.inf)
        l_sc[...] = jnp.zeros_like(l_sc)
        acc_sc[...] = jnp.zeros_like(acc_sc)

    # Block-sparse skip: only do work if this (dst, src) tile has any edges.
    @pl.when(counts_ref[i, j] > 0)
    def _():
        adj_f = adj_ref[...].astype(jnp.float32)             # (M, Nt)
        neg = (adj_f - 1.0) * MASK_BIG                       # 0 on edges, -BIG off
        a_dst = adst_ref[...]                                # (M, H)  f32
        a_srct = asrct_ref[...]                              # (H, Nt) f32
        xw_s = xw_ref[...]                                   # (Nt, H*C) bf16

        for h in range(heads):                               # per-head: temps stay (M,Nt)
            lo, hi = h * out_ch, (h + 1) * out_ch
            e = a_dst[:, h:h + 1] + a_srct[h:h + 1, :]       # (M, Nt)
            e = jnp.maximum(e, NEG_SLOPE * e)                # leaky_relu
            e = e + neg                                      # mask non-edges (pre-max)
            m_prev = m_sc[h]                                 # (M, 1)
            m_new = jnp.maximum(m_prev, jnp.max(e, axis=-1, keepdims=True))
            alpha = jnp.exp(m_prev - m_new)                  # (M, 1)
            p = jnp.exp(e - m_new)                           # (M, Nt); ~0 on non-edges
            l_sc[h] = alpha * l_sc[h] + jnp.sum(p, axis=-1, keepdims=True)
            m_sc[h] = m_new
            acc_sc[:, lo:hi] = alpha * acc_sc[:, lo:hi] + jnp.dot(
                p.astype(jnp.bfloat16), xw_s[:, lo:hi],
                preferred_element_type=jnp.float32)

    @pl.when(j == nj - 1)
    def _():
        bias = bias_ref[...]                                 # (1, out_pad)
        if concat:
            for h in range(heads):
                lo, hi = h * out_ch, (h + 1) * out_ch
                inv_l = pl.reciprocal(l_sc[h], approx=True)  # (M, 1)
                val = acc_sc[:, lo:hi] * inv_l + bias[:, lo:hi]
                if apply_elu:
                    val = jnp.where(val > 0, val, jnp.exp(val) - 1.0)  # F.elu
                out_ref[:, lo:hi] = val.astype(out_ref.dtype)
            tail = out_ref.shape[1] - heads * out_ch
            if tail > 0:                                     # zero the lane padding
                out_ref[:, heads * out_ch:] = jnp.zeros(
                    (out_ref.shape[0], tail), out_ref.dtype)
        else:
            s = jnp.zeros((out_ref.shape[0], out_ch), jnp.float32)
            for h in range(heads):
                lo, hi = h * out_ch, (h + 1) * out_ch
                inv_l = pl.reciprocal(l_sc[h], approx=True)
                s = s + acc_sc[:, lo:hi] * inv_l
            val = s * (1.0 / heads) + bias
            if apply_elu:
                val = jnp.where(val > 0, val, jnp.exp(val) - 1.0)
            out_ref[...] = val.astype(out_ref.dtype)


# ---------------------------------------------------------------------------
# One GATConv layer
# ---------------------------------------------------------------------------
def gat_conv(x, adj_i8, W, att_src, att_dst, bias, *, heads, out_ch, concat,
             apply_elu):
    """x: (N, F_in) f32; adj_i8: (N, N) int8 mask, adj[dst, src]=1 (self-loops in);
       W: (F_in, heads*out_ch); att_src/att_dst: (heads, out_ch); bias: (out_dim,)."""
    N, f_in = x.shape
    hc = heads * out_ch
    out_dim = hc if concat else out_ch

    # ---- tiling -----------------------------------------------------------
    if N <= 512:
        n_pad = _round_up(N, 8)
        tile_s = n_pad                                        # full lane dim
        tile_d = n_pad // 2 if n_pad % 16 == 0 else n_pad     # grid[0] >= 2 (v7x)
    else:
        tile_d, tile_s = 256, 512                             # multiples of 128
        n_pad = _round_up(N, 512)
    tile_p = tile_s

    # ---- pad; give padded rows a self-loop so their softmax stays finite ---
    if n_pad != N:
        pad = n_pad - N
        x = jnp.pad(x, ((0, pad), (0, 0)))
        adj_i8 = jnp.pad(adj_i8, ((0, pad), (0, pad)))
        idx = jnp.arange(N, n_pad)
        adj_i8 = adj_i8.at[idx, idx].set(1)

    # Per-(dst-tile, src-tile) edge counts for block-sparse skipping.
    n_i, n_j = n_pad // tile_d, n_pad // tile_s
    counts = adj_i8.astype(jnp.int32).reshape(n_i, tile_d, n_j, tile_s).sum(axis=(1, 3))

    # ---- hoisted projection (heads folded into the lane dim) ---------------
    x_bf = x.astype(jnp.bfloat16)
    w_bf = W.astype(jnp.bfloat16)                             # (F_in, H*C)
    eye = jnp.eye(heads, dtype=jnp.float32)
    aw_src = (att_src.astype(jnp.float32)[:, :, None]
              * eye[:, None, :]).reshape(hc, heads).astype(jnp.bfloat16)
    aw_dst = (att_dst.astype(jnp.float32)[:, :, None]
              * eye[:, None, :]).reshape(hc, heads).astype(jnp.bfloat16)
    xw, a_src, a_dst = _project(x_bf, w_bf, aw_src, aw_dst, tile_p=tile_p)
    a_srct = a_src.T                                          # (H, N_pad)

    # ---- lane-dense output for the concat layer (64 -> 128 lanes) ----------
    out_pad = _round_up(out_dim, 128) if concat else out_dim
    bias_row = jnp.zeros((1, out_pad), jnp.float32)
    bias_row = bias_row.at[0, :out_dim].set(bias.astype(jnp.float32))

    kernel = functools.partial(_gat_attn_kernel, heads=heads, out_ch=out_ch,
                               concat=concat, apply_elu=apply_elu)

    out = pl.pallas_call(
        kernel,
        out_shape=jax.ShapeDtypeStruct((n_pad, out_pad), jnp.float32),
        grid_spec=pltpu.PrefetchScalarGridSpec(
            num_scalar_prefetch=1,
            grid=(n_i, n_j),
            in_specs=[
                pl.BlockSpec((tile_d, heads), lambda i, j, c: (i, 0)),    # a_dst
                pl.BlockSpec((heads, tile_s), lambda i, j, c: (0, j)),    # a_src^T
                pl.BlockSpec((tile_s, hc), lambda i, j, c: (j, 0)),       # xw (src)
                pl.BlockSpec((tile_d, tile_s), lambda i, j, c: (i, j)),   # adj int8
                pl.BlockSpec((1, out_pad), lambda i, j, c: (0, 0)),       # bias
            ],
            out_specs=pl.BlockSpec((tile_d, out_pad), lambda i, j, c: (i, 0)),
            scratch_shapes=[
                pltpu.VMEM((heads, tile_d, 1), jnp.float32),   # m (online max)
                pltpu.VMEM((heads, tile_d, 1), jnp.float32),   # l (online denom)
                pltpu.VMEM((tile_d, hc), jnp.float32),         # flat accumulator
            ]),
        compiler_params=pltpu.CompilerParams(
            dimension_semantics=("parallel", "arbitrary"),
            vmem_limit_bytes=48 * 1024 * 1024),
    )(counts, a_dst, a_srct, xw, adj_i8, bias_row)

    return out[:N, :out_dim]


def gat_forward(x, adj_i8, params, *, heads_in, hidden, out_ch):
    # x = dropout(x) -> identity in eval mode
    h = gat_conv(x, adj_i8, params["W1"], params["att_src1"], params["att_dst1"],
                 params["b1"], heads=heads_in, out_ch=hidden, concat=True,
                 apply_elu=True)                      # conv1 + F.elu fused in-kernel
    # h = dropout(h) -> identity in eval mode
    out = gat_conv(h, adj_i8, params["W2"], params["att_src2"], params["att_dst2"],
                   params["b2"], heads=1, out_ch=out_ch, concat=False,
                   apply_elu=False)                   # conv2
    return out


def _glorot(key, shape):
    fan_in, fan_out = shape[0], shape[-1]
    lim = (6.0 / (fan_in + fan_out)) ** 0.5
    return jax.random.uniform(key, shape, jnp.float32, -lim, lim)


if __name__ == "__main__":
    N, IN_CH, HIDDEN, OUT_CH, HEADS, E = 32, 16, 8, 4, 8, 96

    key = jax.random.PRNGKey(0)
    keys = jax.random.split(key, 10)

    # Deterministic inputs: node features + random edge list (PyG convention:
    # edge_index[0] = source, edge_index[1] = target; messages flow src -> dst).
    x = jax.random.normal(keys[0], (N, IN_CH), jnp.float32)
    edge_index = jax.random.randint(keys[1], (2, E), 0, N)

    adj = jnp.zeros((N, N), jnp.int8)
    adj = adj.at[edge_index[1], edge_index[0]].set(1)
    diag = jnp.arange(N)
    adj = adj.at[diag, diag].set(1)  # add_self_loops=True

    params = {
        # conv1: in_channels -> hidden, heads=8, concat=True
        "W1": _glorot(keys[2], (IN_CH, HEADS * HIDDEN)),
        "att_src1": _glorot(keys[3], (HEADS, HIDDEN)),
        "att_dst1": _glorot(keys[4], (HEADS, HIDDEN)),
        "b1": jnp.zeros((HEADS * HIDDEN,), jnp.float32),
        # conv2: hidden*heads -> out_channels, heads=1, concat=False
        "W2": _glorot(keys[5], (HEADS * HIDDEN, OUT_CH)),
        "att_src2": _glorot(keys[6], (1, OUT_CH)),
        "att_dst2": _glorot(keys[7], (1, OUT_CH)),
        "b2": jnp.zeros((OUT_CH,), jnp.float32),
    }

    out = gat_forward(x, adj, params, heads_in=HEADS, hidden=HIDDEN,
                      out_ch=OUT_CH)
    out = jax.block_until_ready(out)
    assert out.shape == (N, OUT_CH)
    assert bool(jnp.all(jnp.isfinite(out)))
    print("KERNEL_OK")
</pallas_src>

<mosaic_0001>
module attributes {stable_mosaic.version = 11 : i64} {
  func.func @_proj_kernel(%arg0: i32, %arg1: memref<32x16xbf16, #tpu.memory_space<vmem>>, %arg2: memref<16x64xbf16, #tpu.memory_space<vmem>>, %arg3: memref<64x8xbf16, #tpu.memory_space<vmem>>, %arg4: memref<64x8xbf16, #tpu.memory_space<vmem>>, %arg5: memref<32x64xbf16, #tpu.memory_space<vmem>>, %arg6: memref<32x8xf32, #tpu.memory_space<vmem>>, %arg7: memref<32x8xf32, #tpu.memory_space<vmem>>) attributes {dimension_semantics = [#tpu.dimension_semantics<parallel>], iteration_bounds = array<i64: 1>, scalar_prefetch = 0 : i64, scratch_operands = 0 : i64, tpu.core_type = #tpu.core_type<tc>, window_params = [{transform_indices = @transform_0, window_bounds = array<i64: 32, 16>}, {pipeline_mode = #tpu.pipeline_mode<synchronous>, transform_indices = @transform_1, window_bounds = array<i64: 16, 64>}, {pipeline_mode = #tpu.pipeline_mode<synchronous>, transform_indices = @transform_2, window_bounds = array<i64: 64, 8>}, {pipeline_mode = #tpu.pipeline_mode<synchronous>, transform_indices = @transform_3, window_bounds = array<i64: 64, 8>}, {transform_indices = @transform_4, window_bounds = array<i64: 32, 64>}, {transform_indices = @transform_5, window_bounds = array<i64: 32, 8>}, {transform_indices = @transform_6, window_bounds = array<i64: 32, 8>}]} {
    %c0 = arith.constant 0 : index
    %c0_0 = arith.constant 0 : index
    %0 = vector.load %arg1[%c0, %c0_0] : memref<32x16xbf16, #tpu.memory_space<vmem>>, vector<32x16xbf16>
    %c0_1 = arith.constant 0 : index
    %c0_2 = arith.constant 0 : index
    %1 = vector.load %arg2[%c0_1, %c0_2] : memref<16x64xbf16, #tpu.memory_space<vmem>>, vector<16x64xbf16>
    %cst = arith.constant dense<0.000000e+00> : vector<32x64xf32>
    %2 = tpu.matmul %0, %1, %cst {dimension_numbers = #tpu.dot_dimension_numbers<[1], [0], [0], [1], [0, 0, 1, 1], [], []>} : vector<32x16xbf16>, vector<16x64xbf16>, vector<32x64xf32> -> vector<32x64xf32>
    %3 = arith.truncf %2 : vector<32x64xf32> to vector<32x64xbf16>
    %c0_3 = arith.constant 0 : index
    %c0_4 = arith.constant 0 : index
    %4 = vector.load %arg5[%c0_3, %c0_4] : memref<32x64xbf16, #tpu.memory_space<vmem>>, vector<32x64xbf16>
    tpu.vector_store %arg5[%c0_3, %c0_4], %3 {strides = array<i32>} : memref<32x64xbf16, #tpu.memory_space<vmem>>, vector<32x64xbf16>,
    %c0_5 = arith.constant 0 : index
    %c0_6 = arith.constant 0 : index
    %5 = vector.load %arg3[%c0_5, %c0_6] : memref<64x8xbf16, #tpu.memory_space<vmem>>, vector<64x8xbf16>
    %cst_7 = arith.constant dense<0.000000e+00> : vector<32x8xf32>
    %6 = tpu.matmul %3, %5, %cst_7 {dimension_numbers = #tpu.dot_dimension_numbers<[1], [0], [0], [1], [0, 0, 1, 1], [], []>} : vector<32x64xbf16>, vector<64x8xbf16>, vector<32x8xf32> -> vector<32x8xf32>
    %c0_8 = arith.constant 0 : index
    %c0_9 = arith.constant 0 : index
    %7 = vector.load %arg6[%c0_8, %c0_9] : memref<32x8xf32, #tpu.memory_space<vmem>>, vector<32x8xf32>
    tpu.vector_store %arg6[%c0_8, %c0_9], %6 {strides = array<i32>} : memref<32x8xf32, #tpu.memory_space<vmem>>, vector<32x8xf32>,
    %c0_10 = arith.constant 0 : index
    %c0_11 = arith.constant 0 : index
    %8 = vector.load %arg4[%c0_10, %c0_11] : memref<64x8xbf16, #tpu.memory_space<vmem>>, vector<64x8xbf16>
    %cst_12 = arith.constant dense<0.000000e+00> : vector<32x8xf32>
    %9 = tpu.matmul %3, %8, %cst_12 {dimension_numbers = #tpu.dot_dimension_numbers<[1], [0], [0], [1], [0, 0, 1, 1], [], []>} : vector<32x64xbf16>, vector<64x8xbf16>, vector<32x8xf32> -> vector<32x8xf32>
    %c0_13 = arith.constant 0 : index
    %c0_14 = arith.constant 0 : index
    %10 = vector.load %arg7[%c0_13, %c0_14] : memref<32x8xf32, #tpu.memory_space<vmem>>, vector<32x8xf32>
    tpu.vector_store %arg7[%c0_13, %c0_14], %9 {strides = array<i32>} : memref<32x8xf32, #tpu.memory_space<vmem>>, vector<32x8xf32>,
    return
  }
  func.func @transform_0(%arg0: i32) -> (i32, i32) {
    %c0_i32 = arith.constant 0 : i32
    %c0_i32_0 = arith.constant 0 : i32
    return %arg0, %c0_i32 : i32, i32
  }
  func.func @transform_1(%arg0: i32) -> (i32, i32) {
    %c0_i32 = arith.constant 0 : i32
    %c0_i32_0 = arith.constant 0 : i32
    %c0_i32_1 = arith.constant 0 : i32
    return %c0_i32, %c0_i32_0 : i32, i32
  }
  func.func @transform_2(%arg0: i32) -> (i32, i32) {
    %c0_i32 = arith.constant 0 : i32
    %c0_i32_0 = arith.constant 0 : i32
    %c0_i32_1 = arith.constant 0 : i32
    return %c0_i32, %c0_i32_0 : i32, i32
  }
  func.func @transform_3(%arg0: i32) -> (i32, i32) {
    %c0_i32 = arith.constant 0 : i32
    %c0_i32_0 = arith.constant 0 : i32
    %c0_i32_1 = arith.constant 0 : i32
    return %c0_i32, %c0_i32_0 : i32, i32
  }
  func.func @transform_4(%arg0: i32) -> (i32, i32) {
    %c0_i32 = arith.constant 0 : i32
    %c0_i32_0 = arith.constant 0 : i32
    return %arg0, %c0_i32 : i32, i32
  }
  func.func @transform_5(%arg0: i32) -> (i32, i32) {
    %c0_i32 = arith.constant 0 : i32
    %c0_i32_0 = arith.constant 0 : i32
    return %arg0, %c0_i32 : i32, i32
  }
  func.func @transform_6(%arg0: i32) -> (i32, i32) {
    %c0_i32 = arith.constant 0 : i32
    %c0_i32_0 = arith.constant 0 : i32
    return %arg0, %c0_i32 : i32, i32
  }
}

</mosaic_0001>

<bundles_post_ra>
// kernel: tpu_custom_call.1
= control target key start
LH: loop header
LB: loop body
LE: loop exit
PB: predicated region body
PF: predicated region fallthrough
CT: control target
= control target key end

     0   :  { %vm44_vm0 = vcmask 130048   ;;  %s546_s0 = inlined_call_operand.vmem [shape: bf16[32,16], index: 0, kind: input, shape index: {}]   ;;  %s547_s1 = inlined_call_operand.vmem [shape: bf16[16,64], index: 1, kind: input, shape index: {}]   ;;  %s548_s2 = inlined_call_operand.vmem [shape: bf16[64,8], index: 2, kind: input, shape index: {}]   ;;  %s549_s3 = inlined_call_operand.vmem [shape: bf16[64,8], index: 3, kind: input, shape index: {}]   ;;  %s550_s4 = inlined_call_operand.hbm [shape: bf16[32,64], index: 4, kind: output, shape index: {0}]   ;;  %s551_s5 = inlined_call_operand.vmem [shape: f32[32,8], index: 5, kind: output, shape index: {1}]   ;;  %s552_s6 = inlined_call_operand.vmem [shape: f32[32,8], index: 6, kind: output, shape index: {2}]  }
   0x1   :  { %v396_v0 = vld [vmem:[%s547_s1] sm:$0xff]   ;;  %v398_v2 = vld [vmem:[%s546_s0 + $0x8] sm:$0xff]   ;;  %v403_v7 = vld [vmem:[%s548_s2 + $0x10] sm:$0xff]  }
   0x2   :  { %v397_v1 = vld [vmem:[%s546_s0] sm:$0xff]   ;;  %363 = vmatprep.subr.bf16.mxu0 %v396_v0  ;;  %v401_v5 = vld [vmem:[%s548_s2 + $0x8] sm:$0xff]   ;;  %v404_v8 = vld [vmem:[%s549_s3 + $0x10] sm:$0xff]  }
   0x3   :  { %364 = vmatpush3.bf16.msra.mxu0 %v396_v0  ;;  %365 = vmatprep.mubr.msk.bf16.mxu0 %vm44_vm0, %v397_v1  ;;  %v399_v3 = vld [vmem:[%s548_s2] sm:$0xff]   ;;  %v402_v6 = vld [vmem:[%s549_s3 + $0x8] sm:$0xff]  }
   0x4   :  { %v400_v4 = vld [vmem:[%s549_s3] sm:$0xff]   ;;  %369 = vmatprep.subr.bf16.mxu1 %v399_v3 }
   0x5   :  { %381 = vmatprep.subr.bf16.mxu0 %v400_v4  ;;  %370 = vmatpush3.bf16.msra.mxu1 %v399_v3 }
   0x6   :  { %366 = vmatmul.mubr.msk.bf16.vlgmr.msra.gmra.mrb[0].mxu0 %vm44_vm0, %v398_v2  ;;  %371 = vmatprep.subr.bf16.mxu1 %v401_v5 }
   0x7   :  { %382 = vmatpush3.bf16.msra.mxu0 %v400_v4 }
   0x8   :  { %383 = vmatprep.subr.bf16.mxu0 %v402_v6 }
   0x9   :  { %12 = vsyncpa [#allocation3], 0  ;;  %372 = vmatpush3.bf16.msra.mxu1 %v401_v5  ;;  %v405_v9 = vld [vmem:[%s548_s2 + $0x18] sm:$0xff]   ;;  %vm116_vm1 = vcmask 519168   ;;  %vm153_vm2 = vcmask 523264   ;;  %s431_s2 = smov [#allocation2]  }
   0xa   :  { %373 = vmatprep.subr.bf16.mxu1 %v403_v7  ;;  %v406_v10 = vld [vmem:[%s549_s3 + $0x18] sm:$0xff]   ;;  %s304_s3 = sshll.u32 %s431_s2, 4  ;;  %s305_s3 = int_to_ptr.vmem [resolvable:$true] %s304_s3 }
   0xb   :  { %384 = vmatpush3.bf16.msra.mxu0 %v402_v6  ;;  %s407_s17 = scalar_lea.vmem %s305_s3, 256  ;;  %p412_p1 = scmp.lt.s32.totalorder %s305_s3, %s305_s3 }
   0xc   :  { %385 = vmatprep.subr.bf16.mxu0 %v404_v8  ;;  %p408_p0 = scmp.ne.s32.totalorder %s305_s3, %s407_s17  ;;  %p413_p2 = scmp.lt.s32.totalorder %s407_s17, %s407_s17 }
   0xd   :  { %374 = vmatpush3.bf16.msra.mxu1 %v403_v7 }
   0xe   :  { %375 = vmatprep.subr.bf16.mxu1 %v405_v9  ;;  %p414_p3 = por %p413_p2, %p412_p1 }
   0xf   :  { %386 = vmatpush3.bf16.msra.mxu0 %v404_v8 }
  0x10   :  { %387 = vmatprep.subr.bf16.mxu0 %v406_v10  ;;  %p415_p4 = pnand %p414_p3, %p408_p0 }
  0x11   :  { %376 = vmatpush3.bf16.msra.mxu1 %v405_v9 }
  0x13   :  { %388 = vmatpush3.bf16.msra.mxu0 %v406_v10 }
  0xd9   :  { %v367_v11 = vpop.f32.mrb[0].mxu0 }
  0xda   :  { %v346_v12 = vpack.c.bf16 %v367_v11, %v367_v11  ;;  %v85_v13 = vpop.f32.mrb[1].mxu0 }
  0xdb   :  { %v344_v14 = vpack.c.bf16 %v85_v13, %v85_v13  ;;  %v368_v15 = vpop.f32.mrb[2].mxu0 }
  0xdc   :  { %119 = vst.msk [vmem:[#allocation2 + $0x8] sm:$0xf] %vm116_vm1, %v346_v12  ;;  %v101_v16 = vpack.c.bf16 %v368_v15, %v367_v11  ;;  %v347_v17 = vpack.c.bf16 %v368_v15, %v368_v15  ;;  %v88_v18 = vpop.f32.mrb[3].mxu0 }
  0xdd   :  { %117 = vst.msk [vmem:[#allocation2] sm:$0xf] %vm116_vm1, %v344_v14  ;;  %v345_v19 = vpack.c.bf16 %v88_v18, %v88_v18  ;;  %v100_v20 = vpack.c.bf16 %v88_v18, %v85_v13 }
  0xde   :  { %120 = vst.msk [vmem:[#allocation2 + $0xc] sm:$0xf] %vm116_vm1, %v347_v17 }
  0xdf   :  { %118 = vst.msk [vmem:[#allocation2 + $0x4] sm:$0xf] %vm116_vm1, %v345_v19  ;;  %377 = vmatprep.mubr.msk.bf16.mxu1 %vm153_vm2, %v100_v20  ;;  %389 = vmatprep.mubr.msk.bf16.mxu0 %vm153_vm2, %v100_v20 }
  0xe0   :  { %378 = vmatmul.mubr.msk.bf16.vlgmr.msra.gmra.mrb[0].mxu1 %vm153_vm2, %v101_v16  ;;  %390 = vmatmul.mubr.msk.bf16.vlgmr.msra.gmra.mrb[4].mxu0 %vm153_vm2, %v101_v16 }
  0xe1   :  { %418 = shalt.err (!%p415_p4)
}
  0xe2   :  { %s419_s20 = scalar_lea.hbm %s550_s4, 256 }
  0xe3   :  { %p420_p5 = scmp.ne.s32.totalorder %s550_s4, %s419_s20  ;;  %p423_p6 = scmp.lt.u32.totalorder %s419_s20, %s550_s4 }
  0xe5   :  { %p425_p7 = pnand %p423_p6, %p420_p5 }
  0xe7   :  { %428 = shalt.err (!%p425_p7)
}
  0xe8   :  { %s432_s25 = smov 64   ;;  %s433_s26 = smov 4   ;;  %vm209_vm3 = vcmask 64512  }
  0xe9   :  { %310 = dma.vmem_to_hbm [thread:$0]  %s305_s3, 256, %s550_s4, [#allocation3], %s432_s25, %s432_s25, %s433_s26  }
 0x1b3   :  { %v379_v21 = vpop.f32.mrb[0].mxu1  ;;  %v391_v22 = vpop.f32.mrb[4].mxu0 }
 0x1b4   :  { %212 = vst.msk [vmem:[%s551_s5 + $0x10] sm:$0xff] %vm209_vm3, %v379_v21  ;;  %297 = vst.msk [vmem:[%s552_s6 + $0x10] sm:$0xff] %vm209_vm3, %v391_v22  ;;  %v194_v23 = vpop.f32.mrb[1].mxu1  ;;  %v280_v24 = vpop.f32.mrb[5].mxu0 }
 0x1b5   :  { %210 = vst.msk [vmem:[%s551_s5] sm:$0xff] %vm209_vm3, %v194_v23  ;;  %295 = vst.msk [vmem:[%s552_s6] sm:$0xff] %vm209_vm3, %v280_v24  ;;  %v380_v25 = vpop.f32.mrb[2].mxu1  ;;  %v392_v26 = vpop.f32.mrb[6].mxu0 }
 0x1b6   :  { %213 = vst.msk [vmem:[%s551_s5 + $0x18] sm:$0xff] %vm209_vm3, %v380_v25  ;;  %298 = vst.msk [vmem:[%s552_s6 + $0x18] sm:$0xff] %vm209_vm3, %v392_v26  ;;  %v197_v27 = vpop.f32.mrb[3].mxu1  ;;  %v283_v28 = vpop.f32.mrb[7].mxu0 }
 0x1b7   :  { %211 = vst.msk [vmem:[%s551_s5 + $0x8] sm:$0xff] %vm209_vm3, %v197_v27  ;;  %296 = vst.msk [vmem:[%s552_s6 + $0x8] sm:$0xff] %vm209_vm3, %v283_v28 }
 0x1b8   :  { %429 = dma.done.wait [#allocation3], 256  }
 0x1b9   :  { %430 = vsyncadd [#allocation3], 4294967040 }
 0x1ba   :  { %322 = vsyncpa [#allocation3], 1 }

</bundles_post_ra>
